<compile_context>
chip_gen: v7x
topology: tpu7x:2x2x1
jax: 0.10.0
libtpu: 0.0.40
codegen_flags: <defaults>
</compile_context>

<pallas_src>
import jax
import jax.numpy as jnp
from jax import lax
from jax.experimental import pallas as pl
from jax.experimental.pallas import tpu as pltpu

IN_FEATURES = 128
OUT_FEATURES = 256
NEGATIVE_SLOPE = 0.1


def linear_leaky_kernel(x_ref, w_ref, b_ref, o_ref):
    # x_ref: (TB, 128) VMEM tile, w_ref: (128, 256), b_ref: (1, 256), o_ref: (TB, 256)
    y = jnp.dot(x_ref[...], w_ref[...], preferred_element_type=jnp.float32)
    y = y + b_ref[...]
    # LeakyReLU: identical to where(y > 0, y, slope*y) for slope in (0, 1),
    # but one vmul + vmax instead of compare + select.
    o_ref[...] = jnp.maximum(y, y * NEGATIVE_SLOPE).astype(o_ref.dtype)


def linear_leaky(x, w, b, *, tb=2048, stream_bf16=False, xla_small_batch_threshold=0):
    """x: (B, 128), w: (128, 256), b: (256,) -> (B, 256) f32."""
    B = x.shape[0]

    # Optional fast path: for very small batches the pallas_call fixed cost
    # dominates; let XLA handle it.  Off by default so the demo exercises the
    # kernel (threshold=0).
    if B <= xla_small_batch_threshold:
        y = jnp.dot(x, w) + b
        return jnp.maximum(y, y * NEGATIVE_SLOPE).astype(jnp.float32)

    # Tiny batches (< 8 rows): pad the sublane dim up to 8 once (negligible
    # bytes) so every BlockSpec dim is legal.  Larger batches rely on Pallas
    # partial-last-block handling instead of a full-array pad + slice.
    Bw = max(B, 8)
    if Bw != B:
        x = jnp.pad(x, ((0, Bw - B), (0, 0)))

    if stream_bf16:
        # Halves the x/W HBM read traffic; accumulate stays f32 in the kernel
        # and the bias add + LeakyReLU run in f32 (v5e VPU has no bf16).
        x = x.astype(jnp.bfloat16)
        w = w.astype(jnp.bfloat16)

    # Tile sizing: multiple of 8 sublanes, and keep the grid length even when
    # it is > 1 so v7x's two TensorCores get balanced work.
    B8 = pl.cdiv(Bw, 8) * 8
    n_tiles = pl.cdiv(B8, tb)
    if n_tiles > 1 and n_tiles % 2 == 1:
        n_tiles += 1
    TB = min(B8, pl.cdiv(pl.cdiv(B8, n_tiles), 8) * 8)
    grid = (pl.cdiv(Bw, TB),)

    b2d = b.reshape(1, OUT_FEATURES).astype(jnp.float32)

    bytes_accessed = (
        x.dtype.itemsize * Bw * IN_FEATURES
        + w.dtype.itemsize * IN_FEATURES * OUT_FEATURES
        + 4 * OUT_FEATURES
        + 4 * Bw * OUT_FEATURES
    )

    out = pl.pallas_call(
        linear_leaky_kernel,
        out_shape=jax.ShapeDtypeStruct((Bw, OUT_FEATURES), jnp.float32),
        grid_spec=pltpu.PrefetchScalarGridSpec(
            num_scalar_prefetch=0,
            grid=grid,
            in_specs=[
                # Batch-tiled activations: double-buffered DMA across steps.
                pl.BlockSpec((TB, IN_FEATURES), lambda i: (i, 0)),
                # Weight and bias: constant index map -> stay resident in VMEM.
                pl.BlockSpec((IN_FEATURES, OUT_FEATURES), lambda i: (0, 0)),
                pl.BlockSpec((1, OUT_FEATURES), lambda i: (0, 0)),
            ],
            out_specs=pl.BlockSpec((TB, OUT_FEATURES), lambda i: (i, 0)),
        ),
        compiler_params=pltpu.CompilerParams(
            # Batch tiles are independent -> shard across both TensorCores on
            # v7x; harmless (single core) on v5e/v6e.
            dimension_semantics=("parallel",),
        ),
        cost_estimate=pl.CostEstimate(
            flops=2 * Bw * IN_FEATURES * OUT_FEATURES,
            bytes_accessed=bytes_accessed,
            transcendentals=0,
        ),
    )(x, w, b2d)

    return out if Bw == B else out[:B]


def _reference(x, w, b):
    y = jnp.dot(x, w, precision=lax.Precision.HIGHEST) + b
    return jnp.where(y > 0, y, y * NEGATIVE_SLOPE)


if __name__ == "__main__":
    key = jax.random.PRNGKey(0)
    kx, kw, kb, kx2 = jax.random.split(key, 4)

    # Deterministic parameter init (mimics nn.Linear uniform init scale).
    # PyTorch stores weight as (out, in); we keep it pre-transposed (in, out).
    bound = 1.0 / jnp.sqrt(IN_FEATURES)
    w = jax.random.uniform(
        kw, (IN_FEATURES, OUT_FEATURES), jnp.float32, -bound, bound
    )
    b = jax.random.uniform(kb, (OUT_FEATURES,), jnp.float32, -bound, bound)

    # Case 1: the spec's input, x1 = torch.randn(1, 128) (tiny 8-row sublane pad).
    x1 = jax.random.normal(kx, (1, IN_FEATURES), jnp.float32)
    out1 = jax.block_until_ready(linear_leaky(x1, w, b))
    ref1 = _reference(x1, w, b)
    assert out1.shape == (1, OUT_FEATURES)
    assert jnp.allclose(out1, ref1, atol=1e-4, rtol=1e-4)

    # Case 2: small multi-tile batch exercising the even-length grid and the
    # partial last block (no full-array pad, no output slice).
    x2 = jax.random.normal(kx2, (300, IN_FEATURES), jnp.float32)
    out2 = jax.block_until_ready(linear_leaky(x2, w, b, tb=128))
    ref2 = _reference(x2, w, b)
    assert out2.shape == (300, OUT_FEATURES)
    assert jnp.allclose(out2, ref2, atol=1e-4, rtol=1e-4)

    print("KERNEL_OK")
</pallas_src>

<mosaic_0001>
module attributes {stable_mosaic.version = 11 : i64} {
  func.func @linear_leaky_kernel(%arg0: i32, %arg1: memref<8x128xf32, #tpu.memory_space<vmem>>, %arg2: memref<128x256xf32, #tpu.memory_space<vmem>>, %arg3: memref<1x256xf32, #tpu.memory_space<vmem>>, %arg4: memref<8x256xf32, #tpu.memory_space<vmem>>) attributes {dimension_semantics = [#tpu.dimension_semantics<parallel>], iteration_bounds = array<i64: 1>, scalar_prefetch = 0 : i64, scratch_operands = 0 : i64, tpu.core_type = #tpu.core_type<tc>, window_params = [{transform_indices = @transform_0, window_bounds = array<i64: 8, 128>}, {pipeline_mode = #tpu.pipeline_mode<synchronous>, transform_indices = @transform_1, window_bounds = array<i64: 128, 256>}, {pipeline_mode = #tpu.pipeline_mode<synchronous>, transform_indices = @transform_2, window_bounds = array<i64: 1, 256>}, {transform_indices = @transform_3, window_bounds = array<i64: 8, 256>}]} {
    %c0 = arith.constant 0 : index
    %c0_0 = arith.constant 0 : index
    %0 = vector.load %arg1[%c0, %c0_0] : memref<8x128xf32, #tpu.memory_space<vmem>>, vector<8x128xf32>
    %c0_1 = arith.constant 0 : index
    %c0_2 = arith.constant 0 : index
    %1 = vector.load %arg2[%c0_1, %c0_2] : memref<128x256xf32, #tpu.memory_space<vmem>>, vector<128x256xf32>
    %cst = arith.constant dense<0.000000e+00> : vector<8x256xf32>
    %2 = tpu.matmul %0, %1, %cst {dimension_numbers = #tpu.dot_dimension_numbers<[1], [0], [0], [1], [0, 0, 1, 1], [], []>} : vector<8x128xf32>, vector<128x256xf32>, vector<8x256xf32> -> vector<8x256xf32>
    %c0_3 = arith.constant 0 : index
    %c0_4 = arith.constant 0 : index
    %3 = vector.load %arg3[%c0_3, %c0_4] : memref<1x256xf32, #tpu.memory_space<vmem>>, vector<1x256xf32>
    %4 = vector.broadcast %3 : vector<1x256xf32> to vector<8x256xf32>
    %5 = arith.addf %2, %4 : vector<8x256xf32>
    %cst_5 = arith.constant 1.000000e-01 : f32
    %6 = vector.broadcast %cst_5 : f32 to vector<8x256xf32>
    %7 = arith.mulf %5, %6 : vector<8x256xf32>
    %8 = arith.maximumf %5, %7 : vector<8x256xf32>
    %c0_6 = arith.constant 0 : index
    %c0_7 = arith.constant 0 : index
    %9 = vector.load %arg4[%c0_6, %c0_7] : memref<8x256xf32, #tpu.memory_space<vmem>>, vector<8x256xf32>
    tpu.vector_store %arg4[%c0_6, %c0_7], %8 {strides = array<i32>} : memref<8x256xf32, #tpu.memory_space<vmem>>, vector<8x256xf32>,
    return
  }
  func.func @transform_0(%arg0: i32) -> (i32, i32) {
    %c0_i32 = arith.constant 0 : i32
    %c0_i32_0 = arith.constant 0 : i32
    return %arg0, %c0_i32 : i32, i32
  }
  func.func @transform_1(%arg0: i32) -> (i32, i32) {
    %c0_i32 = arith.constant 0 : i32
    %c0_i32_0 = arith.constant 0 : i32
    %c0_i32_1 = arith.constant 0 : i32
    return %c0_i32, %c0_i32_0 : i32, i32
  }
  func.func @transform_2(%arg0: i32) -> (i32, i32) {
    %c0_i32 = arith.constant 0 : i32
    %c0_i32_0 = arith.constant 0 : i32
    %c0_i32_1 = arith.constant 0 : i32
    return %c0_i32, %c0_i32_0 : i32, i32
  }
  func.func @transform_3(%arg0: i32) -> (i32, i32) {
    %c0_i32 = arith.constant 0 : i32
    %c0_i32_0 = arith.constant 0 : i32
    return %arg0, %c0_i32 : i32, i32
  }
}

</mosaic_0001>

<bundles_post_ra>
// kernel: tpu_custom_call.1
= control target key start
LH: loop header
LB: loop body
LE: loop exit
PB: predicated region body
PF: predicated region fallthrough
CT: control target
= control target key end

     0   :  { %8 = vsyncpa [#allocation3], 0  ;;  %s361_s0 = inlined_call_operand.hbm [shape: f32[8,128], index: 0, kind: input, shape index: {}]   ;;  %s362_s1 = inlined_call_operand.hbm [shape: f32[128,256], index: 1, kind: input, shape index: {}]   ;;  %s363_s2 = inlined_call_operand.vmem [shape: f32[1,256], index: 2, kind: input, shape index: {}]   ;;  %s364_s3 = inlined_call_operand.hbm [shape: f32[8,256], index: 3, kind: output, shape index: {}]  }
   0x1   :  { %9 = vsyncpa [#allocation6], 0 }
   0x2   :  { %10 = vsyncpa [#allocation4], 0  ;;  %s289_s12 = smov [#allocation2]   ;;  %s290_s14 = smov [#allocation5]  }
   0x3   :  { %s17_s13 = sshll.u32 %s289_s12, 4  ;;  %s26_s15 = sshll.u32 %s290_s14, 4  ;;  %s18_s13 = int_to_ptr.vmem [resolvable:$true] %s17_s13  ;;  %s315_s15 = int_to_ptr.vmem [resolvable:$true] %s26_s15 }
   0x4   :  { %s217_s18 = scalar_lea.hbm %s361_s0, 128 }
   0x5   :  { %p218_p0 = scmp.ne.s32.totalorder %s361_s0, %s217_s18  ;;  %p221_p1 = scmp.lt.u32.totalorder %s217_s18, %s361_s0 }
   0x7   :  { %p223_p2 = pnand %p221_p1, %p218_p0 }
   0x9   :  { %226 = shalt.err (!%p223_p2)
}
   0xa   :  { %s227_s23 = scalar_lea.vmem %s18_s13, 128  ;;  %p232_p4 = scmp.lt.s32.totalorder %s18_s13, %s18_s13 }
   0xb   :  { %p228_p3 = scmp.ne.s32.totalorder %s18_s13, %s227_s23  ;;  %p233_p5 = scmp.lt.s32.totalorder %s227_s23, %s227_s23 }
   0xd   :  { %p234_p6 = por %p233_p5, %p232_p4 }
   0xf   :  { %p235_p7 = pnand %p234_p6, %p228_p3 }
  0x11   :  { %238 = shalt.err (!%p235_p7)
}
  0x12   :  { %20 = dma.hbm_to_vmem [thread:$0]  %s361_s0, 128, %s18_s13, [#allocation3]  }
  0x13   :  { %s239_s28 = scalar_lea.hbm %s362_s1, 4096 }
  0x14   :  { %p240_p8 = scmp.ne.s32.totalorder %s362_s1, %s239_s28  ;;  %p243_p9 = scmp.lt.u32.totalorder %s239_s28, %s362_s1 }
  0x16   :  { %p245_p10 = pnand %p243_p9, %p240_p8 }
  0x18   :  { %248 = shalt.err (!%p245_p10)
}
  0x19   :  { %s249_s6 = scalar_lea.vmem %s315_s15, 4096  ;;  %p254_p12 = scmp.lt.s32.totalorder %s315_s15, %s315_s15 }
  0x1a   :  { %p250_p11 = scmp.ne.s32.totalorder %s315_s15, %s249_s6  ;;  %p255_p13 = scmp.lt.s32.totalorder %s249_s6, %s249_s6 }
  0x1c   :  { %p256_p0 = por %p255_p13, %p254_p12 }
  0x1e   :  { %p257_p1 = pnand %p256_p0, %p250_p11 }
  0x20   :  { %260 = shalt.err (!%p257_p1)
}
  0x21   :  { %s291_s0 = smov 256   ;;  %s292_s7 = smov 16  }
  0x22   :  { %32 = dma.hbm_to_vmem [thread:$0]  %s362_s1, 4096, %s315_s15, [#allocation6], %s291_s0, %s291_s0, %s292_s7  }
  0x23   :  { %283 = dma.done.wait [#allocation3], 128  }
  0x24   :  { %284 = vsyncadd [#allocation3], 4294967168 }
  0x25   :  { %285 = dma.done.wait [#allocation6], 4096  }
  0x26   :  { %286 = vsyncadd [#allocation6], 4294963200  ;;  %v293_v0 = vmov 0.0   ;;  %v43_v1 = vld [vmem:[#allocation5 + $0x8] sm:$0xff]  ;;  %v45_v2 = vld [vmem:[#allocation5 + $0x18] sm:$0xff]  ;;  %v76_v50 = vlaneseq  ;;  %s294_s11 = smov [#allocation7]  }
  0x27   :  { %150 = vmatprep.mubr.f32.mxu0 %v293_v0  ;;  %v42_v3 = vld [vmem:[#allocation5] sm:$0xff]  ;;  %v179_v4 = vpack.c.bf16 %v45_v2, %v43_v1  ;;  %v44_v5 = vld [vmem:[#allocation5 + $0x10] sm:$0xff]  ;;  %v47_v6 = vld [vmem:[#allocation5 + $0x28] sm:$0xff]  ;;  %s169_s12 = sshll.u32 %s294_s11, 4  ;;  %s170_s12 = int_to_ptr.vmem [resolvable:$true] %s169_s12 }
  0x28   :  { %v49_v7 = vld [vmem:[#allocation5 + $0x38] sm:$0xff]  ;;  %v181_v8 = vpack.c.bf16 %v44_v5, %v42_v3  ;;  %v46_v10 = vld [vmem:[#allocation5 + $0x20] sm:$0xff]  ;;  %v48_v11 = vld [vmem:[#allocation5 + $0x30] sm:$0xff]  ;;  %v77_v51 = vshrl.u32 %v76_v50, 7  ;;  %s261_s13 = scalar_lea.vmem %s170_s12, 256  ;;  %p266_p3 = scmp.lt.s32.totalorder %s170_s12, %s170_s12 }
  0x29   :  { %v183_v9 = vpack.c.bf16 %v49_v7, %v47_v6  ;;  %v51_v12 = vld [vmem:[#allocation5 + $0x48] sm:$0xff]  ;;  %180 = vmatprep.subr.bf16.mxu0 %v179_v4  ;;  %v53_v13 = vld [vmem:[#allocation5 + $0x58] sm:$0xff]  ;;  %v185_v14 = vpack.c.bf16 %v48_v11, %v46_v10  ;;  %v50_v16 = vld [vmem:[#allocation5 + $0x40] sm:$0xff]  ;;  %p262_p2 = scmp.ne.s32.totalorder %s170_s12, %s261_s13  ;;  %p267_p4 = scmp.lt.s32.totalorder %s261_s13, %s261_s13 }
  0x2a   :  { %182 = vmatpush1.bf16.msra.mxu0 %v181_v8  ;;  %v187_v15 = vpack.c.bf16 %v53_v13, %v51_v12  ;;  %v52_v17 = vld [vmem:[#allocation5 + $0x50] sm:$0xff]  ;;  %v55_v18 = vld [vmem:[#allocation5 + $0x68] sm:$0xff]  ;;  %v57_v19 = vld [vmem:[#allocation5 + $0x78] sm:$0xff]  ;;  %v78_v52 = vsub.s32 0, %v77_v51  ;;  %v82_v54 = vsub.s32 1, %v77_v51 }
  0x2b   :  { %184 = vmatprep.subr.bf16.mxu0 %v183_v9  ;;  %v189_v20 = vpack.c.bf16 %v52_v17, %v50_v16  ;;  %v191_v21 = vpack.c.bf16 %v57_v19, %v55_v18  ;;  %v54_v22 = vld [vmem:[#allocation5 + $0x60] sm:$0xff]  ;;  %v56_v23 = vld [vmem:[#allocation5 + $0x70] sm:$0xff]  ;;  %v59_v24 = vld [vmem:[#allocation5 + $0x88] sm:$0xff]  ;;  %p268_p5 = por %p267_p4, %p266_p3 }
  0x2c   :  { %v61_v25 = vld [vmem:[#allocation5 + $0x98] sm:$0xff]  ;;  %v193_v26 = vpack.c.bf16 %v56_v23, %v54_v22  ;;  %v58_v28 = vld [vmem:[#allocation5 + $0x80] sm:$0xff]  ;;  %v60_v29 = vld [vmem:[#allocation5 + $0x90] sm:$0xff] }
  0x2d   :  { %v195_v27 = vpack.c.bf16 %v61_v25, %v59_v24  ;;  %v63_v30 = vld [vmem:[#allocation5 + $0xa8] sm:$0xff]  ;;  %v65_v31 = vld [vmem:[#allocation5 + $0xb8] sm:$0xff]  ;;  %v197_v32 = vpack.c.bf16 %v60_v29, %v58_v28  ;;  %v62_v34 = vld [vmem:[#allocation5 + $0xa0] sm:$0xff]  ;;  %p269_p6 = pnand %p268_p5, %p262_p2 }
  0x2e   :  { %186 = vmatpush1.bf16.msra.mxu0 %v185_v14  ;;  %v199_v33 = vpack.c.bf16 %v65_v31, %v63_v30  ;;  %v64_v35 = vld [vmem:[#allocation5 + $0xb0] sm:$0xff]  ;;  %v67_v36 = vld [vmem:[#allocation5 + $0xc8] sm:$0xff]  ;;  %v69_v37 = vld [vmem:[#allocation5 + $0xd8] sm:$0xff] }
  0x2f   :  { %188 = vmatprep.subr.bf16.mxu0 %v187_v15  ;;  %v201_v38 = vpack.c.bf16 %v64_v35, %v62_v34  ;;  %v203_v39 = vpack.c.bf16 %v69_v37, %v67_v36  ;;  %v66_v40 = vld [vmem:[#allocation5 + $0xc0] sm:$0xff]  ;;  %v68_v41 = vld [vmem:[#allocation5 + $0xd0] sm:$0xff]  ;;  %v71_v42 = vld [vmem:[#allocation5 + $0xe8] sm:$0xff] }
  0x30   :  { %v73_v43 = vld [vmem:[#allocation5 + $0xf8] sm:$0xff]  ;;  %v205_v44 = vpack.c.bf16 %v68_v41, %v66_v40  ;;  %v70_v46 = vld [vmem:[#allocation5 + $0xe0] sm:$0xff]  ;;  %v72_v47 = vld [vmem:[#allocation5 + $0xf0] sm:$0xff] }
  0x31   :  { %v207_v45 = vpack.c.bf16 %v73_v43, %v71_v42  ;;  %v209_v48 = vpack.c.bf16 %v72_v47, %v70_v46  ;;  %v41_v49 = vld [vmem:[#allocation2] sm:$0xff] }
  0x32   :  { %190 = vmatpush1.bf16.msra.mxu0 %v189_v20  ;;  %v74_v53 = vld [vmem:[%s363_s2] sm:$0x3] }
  0x33   :  { %192 = vmatprep.subr.bf16.mxu0 %v191_v21  ;;  %v79_v55 = vrot.slane %v74_v53, %v78_v52  ;;  %v83_v56 = vrot.slane %v74_v53, %v82_v54 }
  0x36   :  { %194 = vmatpush1.bf16.msra.mxu0 %v193_v26 }
  0x37   :  { %196 = vmatprep.subr.bf16.mxu0 %v195_v27 }
  0x3a   :  { %198 = vmatpush1.bf16.msra.mxu0 %v197_v32 }
  0x3b   :  { %200 = vmatprep.subr.bf16.mxu0 %v199_v33 }
  0x3e   :  { %202 = vmatpush1.bf16.msra.mxu0 %v201_v38 }
  0x3f   :  { %204 = vmatprep.subr.bf16.mxu0 %v203_v39 }
  0x42   :  { %206 = vmatpush1.bf16.msra.mxu0 %v205_v44 }
  0x43   :  { %208 = vmatprep.subr.bf16.mxu0 %v207_v45 }
  0x46   :  { %210 = vmatpush1.bf16.msra.mxu0 %v209_v48 }
  0x49   :  { %151 = vmatmul.mubr.f32.vlgmr.msra.gmra.mrb[0].mxu0 %v41_v49 }
 0x11c   :  { %v152_v57 = vpop.f32.mrb[0].mxu0 }
 0x11d   :  { %v153_v58 = vadd.f32 %v152_v57, %v79_v55  ;;  %v154_v59 = vpop.f32.mrb[1].mxu0 }
 0x11e   :  { %v155_v60 = vadd.f32 %v154_v59, %v83_v56 }
 0x11f   :  { %v157_v61 = vmul.f32 0.1, %v153_v58 }
 0x120   :  { %v158_v62 = vmul.f32 0.1, %v155_v60 }
 0x121   :  { %v159_v63 = vmax.f32 %v153_v58, %v157_v61 }
 0x122   :  { %v160_v0 = vmax.f32 %v155_v60, %v158_v62 }
 0x123   :  { %161 = vst [vmem:[#allocation7] sm:$0xff] %v159_v63 }
 0x124   :  { %162 = vst [vmem:[#allocation7 + $0x8] sm:$0xff] %v160_v0 }
 0x125   :  { %272 = shalt.err (!%p269_p6)
}
 0x126   :  { %s273_s15 = scalar_lea.hbm %s364_s3, 256 }
 0x127   :  { %p274_p7 = scmp.ne.s32.totalorder %s364_s3, %s273_s15  ;;  %p277_p8 = scmp.lt.u32.totalorder %s273_s15, %s364_s3 }
 0x129   :  { %p279_p9 = pnand %p277_p8, %p274_p7 }
 0x12b   :  { %282 = shalt.err (!%p279_p9)
}
 0x12c   :  { %172 = dma.vmem_to_hbm [thread:$0]  %s170_s12, 256, %s364_s3, [#allocation4]  }
 0x12d   :  { %287 = dma.done.wait [#allocation4], 256  }
 0x12e   :  { %288 = vsyncadd [#allocation4], 4294967040 }
 0x12f   :  { %176 = vsyncpa [#allocation3], 1 }
 0x130   :  { %177 = vsyncpa [#allocation6], 1 }
 0x131   :  { %178 = vsyncpa [#allocation4], 1 }

</bundles_post_ra>
